<compile_context>
chip_gen: v7x
topology: tpu7x:2x2x1
jax: 0.10.0
libtpu: 0.0.40
codegen_flags: <defaults>
</compile_context>

<pallas_src>
import jax
import jax.numpy as jnp
from jax.experimental import pallas as pl
from jax.experimental.pallas import tpu as pltpu

_LANE = 128
_SUBLANE = 8
_TARGET_BLOCK_BYTES = 1 << 20  # ~1 MiB blocks: ~85%+ of HBM roofline, VMEM-safe on v5e/v6e/v7x


def _monitor_record_kernel(x_ref, o_ref):
    # Record / pass-through: copy the observed tile into the monitor's output.
    o_ref[...] = x_ref[...]


def base_monitor_forward(x: jax.Array) -> jax.Array:
    """Pallas 'BaseMonitor' forward: records input and returns it unchanged.

    Works for any shape/dtype; internally uses a lane-dense (rows, 128) view
    with bounded, pipelined row tiles.
    """
    orig_shape = x.shape
    n = x.size
    dtype_bytes = jnp.dtype(x.dtype).itemsize

    # Lane-dense view: flatten fully so the fast axis is a full 128 lanes.
    rows_needed = pl.cdiv(n, _LANE)

    # Bounded row tile: ~1 MiB per block, a multiple of 8 sublanes, capped at
    # the (sublane-rounded) row count for tiny inputs.
    tr_cap = max(
        _SUBLANE,
        (_TARGET_BLOCK_BYTES // (_LANE * dtype_bytes)) // _SUBLANE * _SUBLANE,
    )
    rows_rounded = pl.cdiv(rows_needed, _SUBLANE) * _SUBLANE
    tr = min(tr_cap, rows_rounded)

    # Pad the flat length so the grid divides evenly (no dropped tail block).
    rows = pl.cdiv(rows_needed, tr) * tr
    pad = rows * _LANE - n

    flat = x.reshape(-1)
    if pad:
        flat = jnp.pad(flat, (0, pad))
    x2d = flat.reshape(rows, _LANE)

    out2d = pl.pallas_call(
        _monitor_record_kernel,
        out_shape=jax.ShapeDtypeStruct((rows, _LANE), x.dtype),
        grid=(rows // tr,),
        in_specs=[pl.BlockSpec((tr, _LANE), lambda i: (i, 0))],
        out_specs=pl.BlockSpec((tr, _LANE), lambda i: (i, 0)),
        # Recorded output aliases the observed input buffer: lets XLA elide
        # the HBM round-trip when the input is donatable.
        input_output_aliases={0: 0},
        compiler_params=pltpu.CompilerParams(
            dimension_semantics=("parallel",),
        ),
    )(x2d)

    out_flat = out2d.reshape(-1)
    if pad:
        out_flat = out_flat[:n]
    return out_flat.reshape(orig_shape)


if __name__ == "__main__":
    key = jax.random.PRNGKey(0)
    # Small NCHW input consistent with a spiking-network monitor observing a
    # conv feature map: batch=2, channels=4, spatial=16x16.
    x = jax.random.normal(key, (2, 4, 16, 16), dtype=jnp.float32)

    y = base_monitor_forward(x)
    y = jax.block_until_ready(y)

    assert y.shape == x.shape and y.dtype == x.dtype
    assert bool(jnp.all(y == x))
    print("KERNEL_OK")
</pallas_src>

<mosaic_0001>
module attributes {stable_mosaic.version = 11 : i64} {
  func.func @_monitor_record_kernel(%arg0: i32, %arg1: memref<16x128xf32, #tpu.memory_space<vmem>>, %arg2: memref<16x128xf32, #tpu.memory_space<vmem>>) attributes {dimension_semantics = [#tpu.dimension_semantics<parallel>], iteration_bounds = array<i64: 1>, scalar_prefetch = 0 : i64, scratch_operands = 0 : i64, tpu.core_type = #tpu.core_type<tc>, window_params = [{transform_indices = @transform_0, window_bounds = array<i64: 16, 128>}, {transform_indices = @transform_1, window_bounds = array<i64: 16, 128>}]} {
    %c0 = arith.constant 0 : index
    %c0_0 = arith.constant 0 : index
    %0 = vector.load %arg1[%c0, %c0_0] : memref<16x128xf32, #tpu.memory_space<vmem>>, vector<16x128xf32>
    %c0_1 = arith.constant 0 : index
    %c0_2 = arith.constant 0 : index
    %1 = vector.load %arg2[%c0_1, %c0_2] : memref<16x128xf32, #tpu.memory_space<vmem>>, vector<16x128xf32>
    tpu.vector_store %arg2[%c0_1, %c0_2], %0 {strides = array<i32>} : memref<16x128xf32, #tpu.memory_space<vmem>>, vector<16x128xf32>,
    return
  }
  func.func @transform_0(%arg0: i32) -> (i32, i32) {
    %c0_i32 = arith.constant 0 : i32
    %c0_i32_0 = arith.constant 0 : i32
    return %arg0, %c0_i32 : i32, i32
  }
  func.func @transform_1(%arg0: i32) -> (i32, i32) {
    %c0_i32 = arith.constant 0 : i32
    %c0_i32_0 = arith.constant 0 : i32
    return %arg0, %c0_i32 : i32, i32
  }
}

</mosaic_0001>

<bundles_post_ra>
// kernel: tpu_custom_call.1
= control target key start
LH: loop header
LB: loop body
LE: loop exit
PB: predicated region body
PF: predicated region fallthrough
CT: control target
= control target key end

     0   :  { %6 = vsyncpa [#allocation3], 0  ;;  %s134_s0 = inlined_call_operand.hbm [shape: f32[16,128], index: 0, kind: input, shape index: {}, may-alias: {0,1}]   ;;  %s135_s1 = inlined_call_operand.hbm [shape: f32[16,128], index: 1, kind: output, shape index: {}, may-alias: {0,1}]  }
   0x1   :  { %7 = vsyncpa [#allocation4], 0  ;;  %s96_s6 = smov [#allocation2]   ;;  %s48_s10 = scalar_lea.hbm %s134_s0, 256 }
   0x2   :  { %s13_s7 = sshll.u32 %s96_s6, 4  ;;  %p49_p0 = scmp.ne.s32.totalorder %s134_s0, %s48_s10  ;;  %s14_s7 = int_to_ptr.vmem [resolvable:$true] %s13_s7 }
   0x3   :  { %p52_p1 = scmp.lt.u32.totalorder %s48_s10, %s134_s0 }
   0x5   :  { %p54_p2 = pnand %p52_p1, %p49_p0 }
   0x7   :  { %57 = shalt.err (!%p54_p2)
}
   0x8   :  { %s58_s15 = scalar_lea.vmem %s14_s7, 256  ;;  %p63_p4 = scmp.lt.s32.totalorder %s14_s7, %s14_s7 }
   0x9   :  { %p59_p3 = scmp.ne.s32.totalorder %s14_s7, %s58_s15  ;;  %p64_p5 = scmp.lt.s32.totalorder %s58_s15, %s58_s15 }
   0xb   :  { %p65_p6 = por %p64_p5, %p63_p4 }
   0xd   :  { %p66_p7 = pnand %p65_p6, %p59_p3 }
   0xf   :  { %69 = shalt.err (!%p66_p7)
}
  0x10   :  { %s97_s16 = smov 128   ;;  %s98_s17 = smov 8  }
  0x11   :  { %19 = dma.hbm_to_vmem [thread:$0]  %s134_s0, 256, %s14_s7, [#allocation3], %s97_s16, %s97_s16, %s98_s17  }
  0x12   :  { %92 = dma.done.wait [#allocation3], 256  }
  0x13   :  { %93 = vsyncadd [#allocation3], 4294967040  ;;  %s99_s20 = smov [#allocation5]   ;;  %v23_v0 = vld [vmem:[#allocation2] sm:$0xff]  ;;  %v24_v1 = vld [vmem:[#allocation2 + $0x8] sm:$0xff] }
  0x14   :  { %s32_s21 = sshll.u32 %s99_s20, 4  ;;  %25 = vst [vmem:[#allocation5] sm:$0xff] %v23_v0  ;;  %26 = vst [vmem:[#allocation5 + $0x8] sm:$0xff] %v24_v1  ;;  %s33_s21 = int_to_ptr.vmem [resolvable:$true] %s32_s21 }
  0x15   :  { %s70_s22 = scalar_lea.vmem %s33_s21, 256  ;;  %p75_p9 = scmp.lt.s32.totalorder %s33_s21, %s33_s21 }
  0x16   :  { %p71_p8 = scmp.ne.s32.totalorder %s33_s21, %s70_s22  ;;  %p76_p10 = scmp.lt.s32.totalorder %s70_s22, %s70_s22 }
  0x18   :  { %p77_p11 = por %p76_p10, %p75_p9 }
  0x1a   :  { %p78_p12 = pnand %p77_p11, %p71_p8 }
  0x1c   :  { %81 = shalt.err (!%p78_p12)
}
  0x1d   :  { %s82_s0 = scalar_lea.hbm %s135_s1, 256 }
  0x1e   :  { %p83_p13 = scmp.ne.s32.totalorder %s135_s1, %s82_s0  ;;  %p86_p0 = scmp.lt.u32.totalorder %s82_s0, %s135_s1 }
  0x20   :  { %p88_p1 = pnand %p86_p0, %p83_p13 }
  0x22   :  { %91 = shalt.err (!%p88_p1)
}
  0x23   :  { %38 = dma.vmem_to_hbm [thread:$0]  %s33_s21, 256, %s135_s1, [#allocation4], %s97_s16, %s97_s16, %s98_s17  }
  0x24   :  { %94 = dma.done.wait [#allocation4], 256  }
  0x25   :  { %95 = vsyncadd [#allocation4], 4294967040 }
  0x26   :  { %42 = vsyncpa [#allocation3], 1 }
  0x27   :  { %43 = vsyncpa [#allocation4], 1 }

</bundles_post_ra>
